<compile_context>
chip_gen: v7x
topology: tpu7x:2x2x1
jax: 0.10.0
libtpu: 0.0.40
codegen_flags: <defaults>
</compile_context>

<pallas_src>
import math

import jax
import jax.numpy as jnp
from jax import lax
from jax.experimental import pallas as pl
from jax.experimental.pallas import tpu as pltpu

_LANE = 128
_SUBLANE = 8


def _round_up(x, m):
    return -(-x // m) * m


def _vmem_capacity_bytes():
    """Physical VMEM per TensorCore; used only to pick generation-aware budgets."""
    try:
        info = pltpu.get_tpu_info()
        cap = getattr(info, "vmem_capacity_bytes", None)
        if cap:
            return int(cap)
    except Exception:
        pass
    return 64 << 20  # conservative default (v7x per-TC); safe on every generation


def _make_strips(total, max_size):
    strips, off = [], 0
    while off < total:
        size = min(max_size, total - off)
        strips.append((off, size))
        off += size
    return strips


def _choose_tiling(N, C, HW, itemsize, buf_override=None):
    """Pick (TN, THW, n_hw, vmem_cap)."""
    cap = _vmem_capacity_bytes()
    if cap >= (96 << 20):            # v5e / v6e: 128 MiB physical VMEM, slower HBM
        buf_bytes = 8 << 20
        vmem_cap = 100 << 20
    else:                             # v7x: 64 MiB per TC, ~3.2 TB/s HBM
        buf_bytes = 12 << 20
        vmem_cap = 56 << 20
    if buf_override is not None:      # test hook: force the multi-block path cheaply
        buf_bytes = int(buf_override)

    hw_lane = _round_up(HW, _LANE)
    rows_per_n = -(-C // _SUBLANE)    # f32 vreg-rows per batch row per 128-lane chunk

    # Hard caps bounding in-kernel unroll / code size and per-step accumulation work.
    MAX_CHUNKS = 64
    MAX_WORK_VREGS = 2048             # ~8 MiB of f32 add work per grid step

    def block_ok(tn, thw):
        m = thw // _LANE
        return (tn * C * thw * itemsize <= buf_bytes
                and tn * rows_per_n * m <= MAX_WORK_VREGS
                and m <= MAX_CHUNKS)

    tn = N if N <= _SUBLANE else _SUBLANE

    if block_ok(tn, hw_lane):
        # Single HW block per output tile (small spatial): grow TN to amortize the
        # ~0.35us per-grid-step overhead and the per-tile finalize, while keeping
        # zero N-padding waste and >= 2 blocks on the parallel axis (v7x megacore).
        while (N > _SUBLANE and tn * 2 <= 256
               and N % (tn * 2) == 0 and N // (tn * 2) >= 2
               and block_ok(tn * 2, hw_lane)):
            tn *= 2
        thw = hw_lane
    else:
        # Multi-block HW reduction: largest lane-multiple THW within all budgets
        # (no "THW must divide HW" constraint -- the tail is masked in-kernel).
        by_bytes = (buf_bytes // max(1, tn * C * itemsize)) // _LANE * _LANE
        by_vregs = (MAX_WORK_VREGS // max(1, tn * rows_per_n)) * _LANE
        thw = max(_LANE, min(by_bytes, by_vregs, MAX_CHUNKS * _LANE, hw_lane))

    n_hw = -(-HW // thw)
    return tn, thw, n_hw, vmem_cap


def _build_kernel(*, C, HW, TN, THW, n_hw):
    """Returns (kernel_fn, scratch_shapes). All tiling facts are compile-time statics."""
    rows_per_n = -(-C // _SUBLANE)
    # Strips bound the live register partial in the hot loop to <= ~32 vregs.
    if rows_per_n <= 32:
        n_strips = _make_strips(TN, max(1, 32 // rows_per_n))
        c_strips = [(0, C)]
    else:
        n_strips = _make_strips(TN, 1)
        c_strips = _make_strips(C, 32 * _SUBLANE)

    def project_and_store(pooled_fn, w_ref, o_ref):
        # Once per output tile: cross-strip concat, tiny MXU matmul, EUP sigmoid.
        for (n0, ts) in n_strips:
            cols = [pooled_fn(n0, ts, c0, cs) for (c0, cs) in c_strips]
            pooled = cols[0] if len(cols) == 1 else jnp.concatenate(cols, axis=1)
            att = jnp.dot(pooled, w_ref[...], preferred_element_type=jnp.float32)
            o_ref[n0:n0 + ts, :] = jax.nn.sigmoid(att).astype(o_ref.dtype)

    if n_hw == 1:
        # ---- Single-HW-block fast path: no accumulator scratch, no round trip. ----
        # Block last dim == full HW (legal even when HW % 128 != 0), so the tail is
        # read with an exact (non-128) slice -- no mask, no padding, no extra HBM pass.
        m_full, rem = HW // _LANE, HW % _LANE

        def pooled_strip(x_ref, n0, ts, c0, cs):
            part = None
            for i in range(m_full):
                ch = x_ref[n0:n0 + ts, c0:c0 + cs,
                           i * _LANE:(i + 1) * _LANE].astype(jnp.float32)
                part = ch if part is None else part + ch
            pooled = None if part is None else jnp.sum(part, axis=-1)
            if rem:
                tail = jnp.sum(
                    x_ref[n0:n0 + ts, c0:c0 + cs, m_full * _LANE:HW].astype(jnp.float32),
                    axis=-1)
                pooled = tail if pooled is None else pooled + tail
            return pooled                                       # (ts, cs) f32

        def kernel(x_ref, w_ref, o_ref):
            project_and_store(lambda n0, ts, c0, cs: pooled_strip(x_ref, n0, ts, c0, cs),
                              w_ref, o_ref)

        return kernel, []

    # ---- Multi-block HW reduction with a lane-resident f32 accumulator. ----
    tail_valid = HW - (n_hw - 1) * THW          # valid lanes in the last HW block

    def partial_strip(x_ref, n0, ts, c0, cs, valid):
        """Lane-preserving f32 sum over the first `valid` lanes of this block's strip."""
        m_full, rem = valid // _LANE, valid % _LANE
        part = None
        for i in range(m_full):
            ch = x_ref[n0:n0 + ts, c0:c0 + cs,
                       i * _LANE:(i + 1) * _LANE].astype(jnp.float32)
            part = ch if part is None else part + ch
        if rem:
            ch = x_ref[n0:n0 + ts, c0:c0 + cs,
                       m_full * _LANE:(m_full + 1) * _LANE].astype(jnp.float32)
            lane = lax.broadcasted_iota(jnp.int32, ch.shape, 2)
            ch = jnp.where(lane < rem, ch, 0.0)                 # mask stale tail lanes
            part = ch if part is None else part + ch
        return part                                             # (ts, cs, 128) f32

    def kernel(x_ref, w_ref, o_ref, acc_ref):
        hw = pl.program_id(1)

        @pl.when(hw == 0)
        def _init():
            acc_ref[...] = jnp.zeros_like(acc_ref)

        def accumulate(valid):
            for (n0, ts) in n_strips:
                for (c0, cs) in c_strips:
                    acc_ref[n0:n0 + ts, c0:c0 + cs, :] += partial_strip(
                        x_ref, n0, ts, c0, cs, valid)

        if tail_valid == THW:                    # HW % THW == 0: every block is full
            accumulate(THW)
        else:
            @pl.when(hw < n_hw - 1)
            def _full_blocks():
                accumulate(THW)

            @pl.when(hw == n_hw - 1)
            def _tail_block():
                accumulate(tail_valid)

        @pl.when(hw == n_hw - 1)
        def _finalize():
            project_and_store(
                lambda n0, ts, c0, cs: jnp.sum(acc_ref[n0:n0 + ts, c0:c0 + cs, :], axis=-1),
                w_ref, o_ref)

    return kernel, [pltpu.VMEM((TN, C, _LANE), jnp.float32)]


def assignment_forward(x_nchw, conv_weight, *, _force_buf_bytes=None):
    """x_nchw: (N, C, H, W); conv_weight: (K, C, 1, 1) (PyTorch Conv2d layout)."""
    N, C, H, W = x_nchw.shape
    K = conv_weight.shape[0]
    HW = H * W
    itemsize = jnp.dtype(x_nchw.dtype).itemsize

    # Free reshape for contiguous NCHW -- x is streamed in place, never re-materialized.
    x_flat = x_nchw.reshape(N, C, HW)
    # Fold the 1/(H*W) mean factor into the weight so the hot loop is pure sums.
    w_ck = (conv_weight.reshape(K, C).astype(jnp.float32).T) * (1.0 / float(HW))

    TN, THW, n_hw, vmem_cap = _choose_tiling(N, C, HW, itemsize, _force_buf_bytes)
    kernel, scratch_shapes = _build_kernel(C=C, HW=HW, TN=TN, THW=THW, n_hw=n_hw)

    x_block_hw = HW if n_hw == 1 else THW       # full dim on the single-block path
    grid = (pl.cdiv(N, TN), n_hw)

    # Scoped-VMEM budget: double-buffered x blocks + resident weight/output + accumulator.
    x_block = TN * _round_up(C, _SUBLANE) * _round_up(x_block_hw, _LANE) * itemsize
    w_block = _round_up(C, _SUBLANE) * _round_up(K, _LANE) * 4
    o_block = _round_up(TN, _SUBLANE) * _round_up(K, _LANE) * itemsize
    acc_block = TN * _round_up(C, _SUBLANE) * _LANE * 4 if n_hw > 1 else 0
    need = 2 * x_block + 2 * w_block + 2 * o_block + acc_block + (4 << 20)
    vmem_limit = int(max(min(max(need, 32 << 20), vmem_cap), need))

    return pl.pallas_call(
        kernel,
        out_shape=jax.ShapeDtypeStruct((N, K), x_nchw.dtype),
        grid_spec=pltpu.PrefetchScalarGridSpec(
            num_scalar_prefetch=0,
            grid=grid,
            in_specs=[
                pl.BlockSpec((TN, C, x_block_hw), lambda n, hw: (n, 0, hw)),
                pl.BlockSpec((C, K), lambda n, hw: (0, 0)),   # constant index -> resident
            ],
            out_specs=pl.BlockSpec((TN, K), lambda n, hw: (n, 0)),
            scratch_shapes=scratch_shapes,
        ),
        compiler_params=pltpu.CompilerParams(
            dimension_semantics=("parallel", "arbitrary"),
            vmem_limit_bytes=vmem_limit,
        ),
    )(x_flat, w_ck)


def init_assignment_weight(key, in_planes, K, dtype=jnp.float32):
    # kaiming_normal_(mode='fan_out', nonlinearity='relu') on Conv2d(in_planes, K, 1):
    # weight shape (K, in_planes, 1, 1); fan_out = K*1*1; std = sqrt(2 / fan_out)
    std = math.sqrt(2.0 / K)
    return std * jax.random.normal(key, (K, in_planes, 1, 1), dtype=dtype)


def _reference(x, w):
    K = w.shape[0]
    return jax.nn.sigmoid(x.mean(axis=(2, 3)) @ w.reshape(K, x.shape[1]).T)


if __name__ == "__main__":
    key = jax.random.PRNGKey(0)
    k_x, k_w, k_x2, k_w2 = jax.random.split(key, 4)

    # 1) small shape consistent with the module spec (single-HW-block fast path)
    N, C, H, W, K = 2, 4, 16, 16, 8
    x = jax.random.normal(k_x, (N, C, H, W), dtype=jnp.float32)
    w = init_assignment_weight(k_w, C, K)
    out = jax.block_until_ready(assignment_forward(x, w))
    ref = _reference(x, w)
    assert out.shape == (N, K)
    assert jnp.allclose(out, ref, atol=2e-5, rtol=2e-5), float(jnp.max(jnp.abs(out - ref)))

    # 2) non-multiple-of-128 spatial size: exercises the exact (unpadded) tail slice
    N2, C2, H2, W2, K2 = 8, 16, 56, 56, 4
    x2 = jax.random.normal(k_x2, (N2, C2, H2, W2), dtype=jnp.float32)
    w2 = init_assignment_weight(k_w2, C2, K2)
    out2 = jax.block_until_ready(assignment_forward(x2, w2))
    ref2 = _reference(x2, w2)
    assert out2.shape == (N2, K2)
    assert jnp.allclose(out2, ref2, atol=2e-5, rtol=2e-5), float(jnp.max(jnp.abs(out2 - ref2)))

    # 3) force the multi-block HW reduction (accumulator + masked ragged tail) at the
    #    same small shape by shrinking the per-step buffer budget.
    out3 = jax.block_until_ready(assignment_forward(x2, w2, _force_buf_bytes=64 << 10))
    assert out3.shape == (N2, K2)
    assert jnp.allclose(out3, ref2, atol=2e-5, rtol=2e-5), float(jnp.max(jnp.abs(out3 - ref2)))

    print("KERNEL_OK")
</pallas_src>

<mosaic_0001>
module attributes {stable_mosaic.version = 11 : i64} {
  func.func @kernel(%arg0: i32, %arg1: i32, %arg2: memref<2x4x256xf32, #tpu.memory_space<vmem>>, %arg3: memref<4x8xf32, #tpu.memory_space<vmem>>, %arg4: memref<2x8xf32, #tpu.memory_space<vmem>>) attributes {dimension_semantics = [#tpu.dimension_semantics<parallel>, #tpu.dimension_semantics<arbitrary>], iteration_bounds = array<i64: 1, 1>, scalar_prefetch = 0 : i64, scratch_operands = 0 : i64, tpu.core_type = #tpu.core_type<tc>, window_params = [{transform_indices = @transform_0, window_bounds = array<i64: 2, 4, 256>}, {pipeline_mode = #tpu.pipeline_mode<synchronous>, transform_indices = @transform_1, window_bounds = array<i64: 4, 8>}, {transform_indices = @transform_2, window_bounds = array<i64: 2, 8>}]} {
    %c0 = arith.constant 0 : index
    %c0_0 = arith.constant 0 : index
    %c0_1 = arith.constant 0 : index
    %0 = vector.load %arg2[%c0, %c0_0, %c0_1] : memref<2x4x256xf32, #tpu.memory_space<vmem>>, vector<2x4x128xf32>
    %c0_2 = arith.constant 0 : index
    %c0_3 = arith.constant 0 : index
    %c128 = arith.constant 128 : index
    %1 = vector.load %arg2[%c0_2, %c0_3, %c128] : memref<2x4x256xf32, #tpu.memory_space<vmem>>, vector<2x4x128xf32>
    %2 = arith.addf %0, %1 : vector<2x4x128xf32>
    %cst = arith.constant dense<0.000000e+00> : vector<2x4xf32>
    %3 = vector.multi_reduction <add>, %2, %cst [2] : vector<2x4x128xf32> to vector<2x4xf32>
    %c0_4 = arith.constant 0 : index
    %c0_5 = arith.constant 0 : index
    %4 = vector.load %arg3[%c0_4, %c0_5] : memref<4x8xf32, #tpu.memory_space<vmem>>, vector<4x8xf32>
    %cst_6 = arith.constant dense<0.000000e+00> : vector<2x8xf32>
    %5 = tpu.matmul %3, %4, %cst_6 {dimension_numbers = #tpu.dot_dimension_numbers<[1], [0], [0], [1], [0, 0, 1, 1], [], []>} : vector<2x4xf32>, vector<4x8xf32>, vector<2x8xf32> -> vector<2x8xf32>
    %6 = arith.negf %5 : vector<2x8xf32>
    %7 = math.exp %6 : vector<2x8xf32>
    %cst_7 = arith.constant 1.000000e+00 : f32
    %8 = vector.broadcast %cst_7 : f32 to vector<2x8xf32>
    %9 = arith.addf %8, %7 : vector<2x8xf32>
    %10 = arith.divf %8, %9 : vector<2x8xf32>
    %c0_8 = arith.constant 0 : index
    %c0_9 = arith.constant 0 : index
    %11 = vector.load %arg4[%c0_8, %c0_9] : memref<2x8xf32, #tpu.memory_space<vmem>>, vector<2x8xf32>
    tpu.vector_store %arg4[%c0_8, %c0_9], %10 {strides = array<i32>} : memref<2x8xf32, #tpu.memory_space<vmem>>, vector<2x8xf32>,
    return
  }
  func.func @transform_0(%arg0: i32, %arg1: i32) -> (i32, i32, i32) {
    %c0_i32 = arith.constant 0 : i32
    %c0_i32_0 = arith.constant 0 : i32
    return %arg0, %c0_i32, %arg1 : i32, i32, i32
  }
  func.func @transform_1(%arg0: i32, %arg1: i32) -> (i32, i32) {
    %c0_i32 = arith.constant 0 : i32
    %c0_i32_0 = arith.constant 0 : i32
    %c0_i32_1 = arith.constant 0 : i32
    return %c0_i32, %c0_i32_0 : i32, i32
  }
  func.func @transform_2(%arg0: i32, %arg1: i32) -> (i32, i32) {
    %c0_i32 = arith.constant 0 : i32
    %c0_i32_0 = arith.constant 0 : i32
    return %arg0, %c0_i32 : i32, i32
  }
}

</mosaic_0001>

<bundles_post_ra>
// kernel: tpu_custom_call.1
= control target key start
LH: loop header
LB: loop body
LE: loop exit
PB: predicated region body
PF: predicated region fallthrough
CT: control target
= control target key end

     0   :  { %7 = vsyncpa [#allocation3], 0  ;;  %s320_s0 = inlined_call_operand.hbm [shape: f32[2,4,256], index: 0, kind: input, shape index: {}]   ;;  %s321_s1 = inlined_call_operand.hbm [shape: f32[4,8], index: 1, kind: input, shape index: {}]   ;;  %s322_s2 = inlined_call_operand.hbm [shape: f32[2,8], index: 2, kind: output, shape index: {}]  }
   0x1   :  { %8 = vsyncpa [#allocation6], 0 }
   0x2   :  { %9 = vsyncpa [#allocation4], 0  ;;  %s259_s9 = smov [#allocation2]   ;;  %s187_s13 = scalar_lea.hbm %s320_s0, 256 }
   0x3   :  { %s15_s10 = sshll.u32 %s259_s9, 4  ;;  %p188_p0 = scmp.ne.s32.totalorder %s320_s0, %s187_s13  ;;  %s16_s10 = int_to_ptr.vmem [resolvable:$true] %s15_s10 }
   0x4   :  { %p191_p1 = scmp.lt.u32.totalorder %s187_s13, %s320_s0 }
   0x6   :  { %p193_p2 = pnand %p191_p1, %p188_p0 }
   0x8   :  { %196 = shalt.err (!%p193_p2)
}
   0x9   :  { %s197_s18 = scalar_lea.vmem %s16_s10, 256  ;;  %p202_p4 = scmp.lt.s32.totalorder %s16_s10, %s16_s10 }
   0xa   :  { %p198_p3 = scmp.ne.s32.totalorder %s16_s10, %s197_s18  ;;  %p203_p5 = scmp.lt.s32.totalorder %s197_s18, %s197_s18 }
   0xc   :  { %p204_p6 = por %p203_p5, %p202_p4 }
   0xe   :  { %p205_p7 = pnand %p204_p6, %p198_p3 }
  0x10   :  { %208 = shalt.err (!%p205_p7)
}
  0x11   :  { %s260_s19 = smov 128   ;;  %s261_s20 = smov 8  }
  0x12   :  { %21 = dma.hbm_to_vmem [thread:$0]  %s320_s0, 256, %s16_s10, [#allocation3], %s260_s19, %s260_s19, %s261_s20  }
  0x13   :  { %s262_s23 = smov [#allocation5]   ;;  %s209_s27 = scalar_lea.hbm %s321_s1, 64 }
  0x14   :  { %s28_s24 = sshll.u32 %s262_s23, 4  ;;  %p210_p8 = scmp.ne.s32.totalorder %s321_s1, %s209_s27  ;;  %s29_s24 = int_to_ptr.vmem [resolvable:$true] %s28_s24 }
  0x15   :  { %p213_p9 = scmp.lt.u32.totalorder %s209_s27, %s321_s1 }
  0x17   :  { %p215_p10 = pnand %p213_p9, %p210_p8 }
  0x19   :  { %218 = shalt.err (!%p215_p10)
}
  0x1a   :  { %s219_s4 = scalar_lea.vmem %s29_s24, 64  ;;  %p224_p12 = scmp.lt.s32.totalorder %s29_s24, %s29_s24 }
  0x1b   :  { %p220_p11 = scmp.ne.s32.totalorder %s29_s24, %s219_s4  ;;  %p225_p13 = scmp.lt.s32.totalorder %s219_s4, %s219_s4 }
  0x1d   :  { %p226_p0 = por %p225_p13, %p224_p12 }
  0x1f   :  { %p227_p1 = pnand %p226_p0, %p220_p11 }
  0x21   :  { %230 = shalt.err (!%p227_p1)
}
  0x22   :  { %31 = dma.hbm_to_vmem [thread:$0]  %s321_s1, 64, %s29_s24, [#allocation6]  }
  0x23   :  { %253 = dma.done.wait [#allocation3], 256  }
  0x24   :  { %254 = vsyncadd [#allocation3], 4294967040 }
  0x25   :  { %255 = dma.done.wait [#allocation6], 64  }
  0x26   :  { %256 = vsyncadd [#allocation6], 4294967232  ;;  %vm44_vm0 = vcmask 1043456   ;;  %v38_v0 = vld [vmem:[#allocation2] sm:$0xf]  ;;  %v263_v9 = vmov 0.0   ;;  %v54_v10 = vlaneseq }
  0x27   :  { %v40_v1 = vld [vmem:[#allocation2 + $0x4] sm:$0xf]  ;;  %v39_v2 = vld [vmem:[#allocation2 + $0x8] sm:$0xf]  ;;  %v41_v4 = vld [vmem:[#allocation2 + $0xc] sm:$0xf]  ;;  %171 = vmatprep.subr.mxu0 %v263_v9 }
  0x28   :  { %v42_v3 = vadd.f32 %v40_v1, %v38_v0  ;;  %v43_v5 = vadd.f32 %v41_v4, %v39_v2  ;;  %v51_v8 = vld [vmem:[#allocation5] sm:$0xf]  ;;  %vm264_vm1 = vmmov 0   ;;  %v55_v11 = vand.u32 127, %v54_v10  ;;  %s265_s1 = smov [#allocation7]  }
  0x29   :  { %173 = vmatprep.mubr.msk.f32.mxu0 %vm264_vm1, %v263_v9  ;;  %172 = vmatpush3.msk.msra.mxu0 %vm44_vm0, %v51_v8  ;;  %v57_v12 = vshrl.u32 %v54_v10, 7  ;;  %vm64_vm2 = vcmask 1041409   ;;  %vm66_vm3 = vcmask 31744   ;;  %s156_s6 = sshll.u32 %s265_s1, 4  ;;  %vm148_vm4 = vcmask 58368   ;;  %s157_s6 = int_to_ptr.vmem [resolvable:$true] %s156_s6 }
  0x2a   :  { %v45_v6 = vsel %vm44_vm0, %v42_v3, 0.0  ;;  %v48_v7 = vsel %vm44_vm0, %v43_v5, 0.0  ;;  %s231_s7 = scalar_lea.vmem %s157_s6, 32  ;;  %p236_p3 = scmp.lt.s32.totalorder %s157_s6, %s157_s6 }
  0x2b   :  { %46 = vadd.xlane.f32.xlu0 %v45_v6  ;;  %v58_v14 = vsub.s32 %v55_v11, %v57_v12  ;;  %p232_p2 = scmp.ne.s32.totalorder %s157_s6, %s231_s7  ;;  %p237_p4 = scmp.lt.s32.totalorder %s231_s7, %s231_s7 }
  0x2d   :  { %p238_p5 = por %p237_p4, %p236_p3 }
  0x2f   :  { %49 = vadd.xlane.f32.xlu0 %v48_v7  ;;  %p239_p6 = pnand %p238_p5, %p232_p2 }
  0xb8   :  { %v47_v13 = vpop.xlane.xlu0 %46 }
  0xb9   :  { %v59_v16 = vrot.slane %v47_v13, %v58_v14 }
  0xbc   :  { %v50_v15 = vpop.xlane.xlu0 %49 }
  0xbd   :  { %v63_v17 = vrot.slane %v50_v15, %v58_v14 }
  0xbf   :  { %v65_v18 = vsel %vm64_vm2, %v63_v17, %v59_v16 }
  0xc0   :  { %174 = vmatmul.mubr.msk.f32.vlgmr.msra.gmra.mrb[0].mxu0 %vm66_vm3, %v65_v18 }
 0x193   :  { %v138_v19 = vpop.f32.mrb[0].mxu0 }
 0x194   :  { %v168_v20 = vmul.f32 -1.442695, %v138_v19  ;;  %v175_v21 = vpop.f32.mrb[1].mxu0 }
 0x196   :  { %183 = vpow2.f32 %v168_v20 }
 0x1a0   :  { %v184_v22 = vpop.eup %183 }
 0x1a1   :  { %v145_v23 = vadd.f32 1.0, %v184_v22 }
 0x1a3   :  { %185 = vrcp.f32 %v145_v23 }
 0x1ad   :  { %v186_v24 = vpop.eup %185 }
 0x1ae   :  { %149 = vst.msk [vmem:[#allocation7] sm:$0x3] %vm148_vm4, %v186_v24 }
 0x1af   :  { %242 = shalt.err (!%p239_p6)
}
 0x1b0   :  { %s243_s10 = scalar_lea.hbm %s322_s2, 32 }
 0x1b1   :  { %p244_p7 = scmp.ne.s32.totalorder %s322_s2, %s243_s10  ;;  %p247_p8 = scmp.lt.u32.totalorder %s243_s10, %s322_s2 }
 0x1b3   :  { %p249_p9 = pnand %p247_p8, %p244_p7 }
 0x1b5   :  { %252 = shalt.err (!%p249_p9)
}
 0x1b6   :  { %159 = dma.vmem_to_hbm [thread:$0]  %s157_s6, 32, %s322_s2, [#allocation4]  }
 0x1b7   :  { %257 = dma.done.wait [#allocation4], 32  }
 0x1b8   :  { %258 = vsyncadd [#allocation4], 4294967264 }
 0x1b9   :  { %163 = vsyncpa [#allocation3], 1 }
 0x1ba   :  { %164 = vsyncpa [#allocation6], 1 }
 0x1bb   :  { %165 = vsyncpa [#allocation4], 1 }

</bundles_post_ra>
